<compile_context>
chip_gen: v5e
topology: v5e:2x2
jax: 0.10.0
libtpu: 0.0.40
codegen_flags: <defaults>
</compile_context>

<pallas_src>
import math
import random

import numpy as np
import jax
import jax.numpy as jnp
from jax.experimental import pallas as pl
from jax.experimental.pallas import tpu as pltpu


_GEOM_OPS = ('Identity', 'ShearX', 'ShearY', 'TranslateX', 'TranslateY', 'Rotate', 'Zoom')
_WARP_OPS = ('ShearX', 'ShearY', 'TranslateX', 'TranslateY', 'Rotate', 'Zoom')
_FACTOR_OPS = ('Brightness', 'Color', 'Contrast', 'Sharpness')


# ---------------------------------------------------------------------------
# Host-side geometry: inverse affine coefficients -> nearest source-index map
# ---------------------------------------------------------------------------
def _inverse_affine_coeffs(op_name, magnitude, H, W):
    """Inverse mapping output->source: xs = a*x + b*y + c ; ys = d*x + e*y + f."""
    cx, cy = (W - 1) * 0.5, (H - 1) * 0.5
    tx = ty = 0.0
    if op_name == 'ShearX':
        # PyTorch passes math.degrees(math.atan(m)) as shear degrees; the affine
        # matrix then uses tan(shear) == m, so m is used directly (corner center).
        F = np.array([[1.0, magnitude], [0.0, 1.0]]); cx = cy = 0.0
    elif op_name == 'ShearY':
        F = np.array([[1.0, 0.0], [magnitude, 1.0]]); cx = cy = 0.0
    elif op_name == 'TranslateX':
        F = np.eye(2); tx = float(int(magnitude))
    elif op_name == 'TranslateY':
        F = np.eye(2); ty = float(int(magnitude))
    elif op_name == 'Rotate':
        t = math.radians(magnitude)
        F = np.array([[math.cos(t), -math.sin(t)], [math.sin(t), math.cos(t)]])
    elif op_name == 'Zoom':
        # TODO(synk): torchvision Zoom uses resized_crop (bilinear, int-truncated
        # crop box); approximated here as a nearest-neighbour zoom about the centre.
        scale = max((100.0 - magnitude) / 100.0, 1e-3)
        F = np.eye(2) / scale
    else:
        F = np.eye(2)
    Fi = np.linalg.inv(F)
    a, b = Fi[0]
    d, e = Fi[1]
    c0 = -a * (tx + cx) - b * (ty + cy) + cx
    f0 = -d * (tx + cx) - e * (ty + cy) + cy
    return float(a), float(b), float(c0), float(d), float(e), float(f0)


def _src_index_map(op_name, magnitude, H, W):
    """(HW,) int32 nearest-neighbour source flat index per output pixel; -1 = OOB."""
    a, b, c0, d, e, f0 = _inverse_affine_coeffs(op_name, magnitude, H, W)
    yo, xo = np.meshgrid(np.arange(H, dtype=np.float64),
                         np.arange(W, dtype=np.float64), indexing='ij')
    xs = a * xo + b * yo + c0
    ys = d * xo + e * yo + f0
    xr = np.floor(xs + 0.5).astype(np.int64)
    yr = np.floor(ys + 0.5).astype(np.int64)
    inb = (xr >= 0) & (xr < W) & (yr >= 0) & (yr < H)
    return np.where(inb, yr * W + xr, -1).astype(np.int32).reshape(-1)


def _compose_src(first, second):
    """Index map of (warp `first`, then warp `second`); -1 (fill) propagates."""
    return np.where(second < 0, -1, first[np.maximum(second, 0)]).astype(np.int32)


_MASK_CACHE = {}


def _interior_mask(H, W):
    """(1, HW) float32 mask: 1.0 on interior pixels (Sharpness), 0.0 on the border."""
    key = (H, W)
    m = _MASK_CACHE.get(key)
    if m is None:
        row, col = np.meshgrid(np.arange(H), np.arange(W), indexing='ij')
        inner = ((row >= 1) & (row <= H - 2) & (col >= 1) & (col <= W - 2))
        m = jnp.asarray(inner.astype(np.float32).reshape(1, H * W))
        _MASK_CACHE[key] = m
    return m


# ---------------------------------------------------------------------------
# Host-side chain construction (op list is static -> fused kernel is static)
# ---------------------------------------------------------------------------
def _build_segments(ops, H, W, fill_value):
    """ops: list of (op_name, magnitude). Returns (segments, params, src_maps)."""
    segments, params, src_maps = [], [], []
    for op_name, magnitude in ops:
        if op_name in ('Identity', 'Equalize'):
            # TODO(synk): Equalize (per-channel histogram-equalization LUT) has no
            # clean vectorized Pallas mapping here; passed through as identity.
            continue
        if op_name in _WARP_OPS:
            smap = _src_index_map(op_name, magnitude, H, W)
            if segments and segments[-1]['kind'] == 'warp':
                slot = segments[-1]['slot']
                src_maps[slot] = _compose_src(src_maps[slot], smap)
            else:
                params.append(float(fill_value))
                segments.append({'kind': 'warp', 'slot': len(src_maps),
                                 'p': len(params) - 1})
                src_maps.append(smap)
        elif op_name in _FACTOR_OPS:
            params.append(1.0 + magnitude)
            segments.append({'kind': op_name, 'p': len(params) - 1})
        elif op_name == 'Posterize':
            bits = int(magnitude)
            params.append(float(2 ** (8 - bits)))      # quantization step
            segments.append({'kind': 'Posterize', 'p': len(params) - 1})
        elif op_name == 'Solarize':
            params.append(float(magnitude))
            segments.append({'kind': 'Solarize', 'p': len(params) - 1})
        elif op_name == 'AutoContrast':
            segments.append({'kind': 'AutoContrast'})
        else:
            raise ValueError(f'The provided operator {op_name} is not recognized.')
    return segments, params, src_maps


# ---------------------------------------------------------------------------
# The single fused Pallas kernel for the whole op chain
# ---------------------------------------------------------------------------
def _build_chain_kernel(segments, C, H, W, n_warps, has_sharp, use_gather):
    HW = H * W

    def kernel(*refs):
        i = 0
        params_ref = refs[i]; i += 1
        src_ref = None
        if n_warps > 0:
            src_ref = refs[i]; i += 1
        mask_ref = None
        if has_sharp:
            mask_ref = refs[i]; i += 1
        x_ref, o_ref = refs[i], refs[i + 1]

        x = x_ref[...]                                  # (C, HW) f32, values in [0, 255]
        # TODO(synk): elementwise segments run on the (C, HW) layout (C=3 fills only
        # 3/8 sublanes); a sublane-dense reshape around pure-elementwise runs would
        # raise VPU throughput but costs extra layout copies for channel-mixing ops.

        for seg in segments:
            kind = seg['kind']
            if kind == 'warp':
                fill = params_ref[seg['p']]
                src = src_ref[pl.ds(seg['slot'], 1), :]        # (1, HW) int32, -1 == OOB
                inb = src >= 0
                # Round to integer pixel values before warping — mirrors torchvision's
                # uint8 input to F.affine.
                xq = jnp.floor(x + 0.5)
                if use_gather:
                    # In-kernel gather along the lane axis: out[c, p] = xq[c, src[p]].
                    idx = jnp.broadcast_to(jnp.maximum(src, 0), (C, HW))
                    warped = jnp.take_along_axis(xq, idx, axis=1)
                else:
                    # Fallback (tiny images only): one-hot selection matmul built
                    # directly in bf16 (no f32 (HW, HW) temporary).
                    s_iota = jax.lax.broadcasted_iota(jnp.int32, (HW, 1), 0)
                    sel = jnp.where(s_iota == src,
                                    jnp.bfloat16(1.0), jnp.bfloat16(0.0))
                    warped = jnp.dot(xq.astype(jnp.bfloat16), sel,
                                     preferred_element_type=jnp.float32)
                x = jnp.where(inb, warped, fill)
            elif kind == 'Brightness':
                x = jnp.clip(x * params_ref[seg['p']], 0.0, 255.0)
            elif kind == 'Solarize':
                x = jnp.where(x >= params_ref[seg['p']], 255.0 - x, x)
            elif kind == 'Posterize':
                step = params_ref[seg['p']]             # == 2 ** (8 - bits)
                # TODO(synk): float approximation of uint8 bitwise-AND posterize.
                x = jnp.floor(jnp.floor(x) / step) * step
            elif kind in ('Contrast', 'Color'):
                f = params_ref[seg['p']]
                if C == 3:
                    gray = 0.2989 * x[0:1] + 0.587 * x[1:2] + 0.114 * x[2:3]
                else:
                    gray = x[0:1]
                gray = jnp.floor(gray)                  # torchvision truncates gray to uint8
                base = jnp.mean(gray) if kind == 'Contrast' else gray
                x = jnp.clip(f * x + (1.0 - f) * base, 0.0, 255.0)
            elif kind == 'Sharpness':
                f = params_ref[seg['p']]
                interior = mask_ref[...] > 0.5          # host-precomputed (no div/mod)
                # 3x3 box sum via lane rotations of the flattened image; the wrapped
                # rows/cols only affect border pixels, which keep the original value.
                box = x
                for s in (1, W - 1, W, W + 1):
                    box = box + pltpu.roll(x, s, axis=1) + pltpu.roll(x, HW - s, axis=1)
                blur = jnp.clip((box + 4.0 * x) * (1.0 / 13.0), 0.0, 255.0)
                blurred = jnp.where(interior, blur, x)
                x = jnp.clip(f * x + (1.0 - f) * blurred, 0.0, 255.0)
            elif kind == 'AutoContrast':
                mn = jnp.min(x, axis=1, keepdims=True)
                mx = jnp.max(x, axis=1, keepdims=True)
                degenerate = mx <= mn
                scale = 255.0 / jnp.where(degenerate, 1.0, mx - mn)
                x = jnp.where(degenerate, x,
                              jnp.clip((x - mn) * scale, 0.0, 255.0))

        o_ref[...] = x

    return kernel


def _vmem_budget(C, HW, n_warps, has_sharp, use_gather):
    """Generation-aware VMEM limit: real footprint, capped at 3/4 of capacity."""
    try:
        cap = int(pltpu.get_tpu_info().vmem_capacity_bytes)
    except Exception:
        cap = 64 * 1024 * 1024                      # conservative (v7x per-TC)
    need = 4 * 4 * C * HW                           # double-buffered in/out image blocks
    need += 2 * 4 * (n_warps * HW + (HW if has_sharp else 0))
    need += 8 * 4 * C * HW                          # elementwise temporaries
    if n_warps and not use_gather:
        need += 6 * HW * HW                         # one-hot fallback temporaries
    need += 4 << 20                                 # headroom for internal scratch
    return int(min(cap * 3 // 4, max(need, 32 << 20)))


def _build_pallas_fn(segments, B, C, H, W, n_warps, has_sharp, use_gather):
    HW = H * W
    kernel = _build_chain_kernel(segments, C, H, W, n_warps, has_sharp, use_gather)

    in_specs = [pl.BlockSpec(memory_space=pltpu.MemorySpace.SMEM)]        # params
    if n_warps > 0:
        in_specs.append(pl.BlockSpec((n_warps, HW), lambda b: (0, 0)))    # src maps
    if has_sharp:
        in_specs.append(pl.BlockSpec((1, HW), lambda b: (0, 0)))          # interior mask
    in_specs.append(pl.BlockSpec((None, C, HW), lambda b: (b, 0, 0)))     # image block

    call = pl.pallas_call(
        kernel,
        out_shape=jax.ShapeDtypeStruct((B, C, HW), jnp.float32),
        grid=(B,),
        in_specs=in_specs,
        out_specs=pl.BlockSpec((None, C, HW), lambda b: (b, 0, 0)),
        compiler_params=pltpu.CompilerParams(
            # batch axis "parallel": v7x splits it across both TensorCores.
            dimension_semantics=("parallel",),
            vmem_limit_bytes=_vmem_budget(C, HW, n_warps, has_sharp, use_gather)),
    )
    return jax.jit(call)


# Compiled-kernel cache keyed on the chain signature (kinds) + shapes.
_COMPILED_CACHE = {}


def _apply_op_chain(img, ops, fill_value=0.0):
    """Apply a statically-known list of (op_name, magnitude) ops as ONE fused
    Pallas kernel over a (B, C, H, W) or (C, H, W) image batch."""
    squeeze = (img.ndim == 3)
    x = img[None] if squeeze else img
    B, C, H, W = x.shape
    HW = H * W

    segments, params, src_maps = _build_segments(ops, H, W, fill_value)
    if not segments:
        out = x.astype(jnp.float32)
        return out[0] if squeeze else out

    kinds = tuple(s['kind'] for s in segments)
    n_warps = len(src_maps)
    has_sharp = any(k == 'Sharpness' for k in kinds)

    params_arr = jnp.asarray(np.asarray(params + [0.0], np.float32))
    args = [params_arr]
    if n_warps > 0:
        args.append(jnp.asarray(np.stack(src_maps, axis=0)))   # (NW, HW) int32
    if has_sharp:
        args.append(_interior_mask(H, W))                      # (1, HW) f32
    args.append(x.reshape(B, C, HW).astype(jnp.float32))

    key = (kinds, B, C, H, W)
    fn = _COMPILED_CACHE.get(key)
    if fn is not None:
        out = fn(*args)
    else:
        out = None
        # Prefer the gather warp; fall back to the (proven) one-hot matmul only if
        # the lane-axis dynamic-gather pattern is unsupported by this Mosaic build.
        for use_gather in (True, False):
            fn = _build_pallas_fn(segments, B, C, H, W, n_warps, has_sharp, use_gather)
            try:
                out = fn(*args)
                break
            except Exception:
                if not use_gather:
                    raise
        _COMPILED_CACHE[key] = fn

    out = out.reshape(B, C, H, W)
    return out[0] if squeeze else out


# ---------------------------------------------------------------------------
# RandAugmentWithLabels port (host-side op sampling, fused Pallas execution)
# ---------------------------------------------------------------------------
class RandAugmentWithLabelsPallas:
    """Pallas/JAX port of RandAugmentWithLabels.forward. Accepts (C, H, W) or
    (B, C, H, W) images (uint8 values stored as float32 in [0, 255]); the same
    sampled op chain is applied to every image in the batch (as torchvision does
    for leading batch dims)."""

    def __init__(self, num_max_ops=2, magnitude=9, num_magnitude_bins=31,
                 fill=None, seed=0):
        self.num_max_ops = num_max_ops
        self.magnitude = magnitude
        self.num_magnitude_bins = num_magnitude_bins
        self.fill = fill
        self._rng = random.Random(seed)   # replaces random.* / torch.rand in forward

    def _augmentation_space(self, num_bins, image_size):
        return {
            'Identity': (np.array(0.0), False),
            'ShearX': (np.linspace(0.0, 0.3, num_bins), True),
            'ShearY': (np.linspace(0.0, 0.3, num_bins), True),
            'TranslateX': (np.linspace(0.0, 150.0 / 331.0 * image_size[0], num_bins), True),
            'TranslateY': (np.linspace(0.0, 150.0 / 331.0 * image_size[1], num_bins), True),
            'Rotate': (np.linspace(0.0, 45.0, num_bins), True),
            'Zoom': (np.linspace(0.0, 50.0, num_bins), False),
            'Brightness': (np.linspace(0.0, 0.9, num_bins), True),
            'Color': (np.linspace(0.0, 0.9, num_bins), True),
            'Contrast': (np.linspace(0.0, 0.9, num_bins), True),
            'Sharpness': (np.linspace(0.0, 0.9, num_bins), True),
            'Posterize': (8 - np.round(np.arange(num_bins) / ((num_bins - 1) / 4)).astype(int), False),
            'Solarize': (np.linspace(255.0, 0.0, num_bins), False),
            'AutoContrast': (np.array(0.0), False),
            'Equalize': (np.array(0.0), False),
        }

    def __call__(self, img):
        C, H, W = img.shape[-3], img.shape[-2], img.shape[-1]
        fill = self.fill
        if isinstance(fill, (int, float)):
            fill = [float(fill)] * C
        elif fill is not None:
            fill = [float(f) for f in fill]
        # TODO(synk): per-channel fill uses the first channel's value in-kernel.
        fill_value = 0.0 if fill is None else float(fill[0])

        ops, op_trace = [], []
        for _ in range(self._rng.randint(0, self.num_max_ops)):
            op_meta = self._augmentation_space(self.num_magnitude_bins, (W, H))
            op_index = self._rng.randrange(len(op_meta))
            op_name = list(op_meta.keys())[op_index]
            magnitudes, signed = op_meta[op_name]
            magnitude = float(magnitudes[self.magnitude]) if magnitudes.ndim > 0 else 0.0
            magnitude = self._rng.random() * magnitude
            if signed and self._rng.randrange(2):
                magnitude *= -1.0
            ops.append((op_name, magnitude))
            if op_name in _GEOM_OPS:
                op_trace.append((op_name, magnitude, "nearest", fill))

        # TODO(synk): torchvision's uint8 truncation between photometric ops is not
        # replicated; intermediates stay float32 (pixels are re-quantized only
        # immediately before geometric warps).
        img = _apply_op_chain(img, ops, fill_value)
        return img, op_trace


# ---------------------------------------------------------------------------
if __name__ == "__main__":
    key = jax.random.PRNGKey(0)
    # Small batched CHW images consistent with the module ([..., 3, H, W] uint8 semantics).
    imgs = jnp.clip(jnp.floor(jax.random.uniform(key, (2, 3, 16, 16),
                                                 jnp.float32, 0.0, 256.0)), 0.0, 255.0)

    aug = RandAugmentWithLabelsPallas(num_max_ops=2, magnitude=9,
                                      num_magnitude_bins=31, fill=None, seed=0)
    out, op_trace = aug(imgs)
    out = jax.block_until_ready(out)
    assert out.shape == imgs.shape and out.dtype == jnp.float32

    # Explicitly exercise every op branch (and geometric-warp composition) in a
    # single fused chain — the sampler above may legally draw 0 ops.
    demo_ops = [('Rotate', 30.0), ('ShearX', 0.2), ('TranslateY', 3.0), ('Zoom', 20.0),
                ('Brightness', 0.3), ('Color', 0.4), ('Contrast', 0.2),
                ('Sharpness', 0.6), ('Posterize', 4.0), ('Solarize', 128.0),
                ('AutoContrast', 0.0), ('Equalize', 0.0), ('Identity', 0.0)]
    demo = jax.block_until_ready(_apply_op_chain(imgs, demo_ops, 0.0))
    assert demo.shape == imgs.shape
    assert bool(jnp.all(jnp.isfinite(demo)))
    assert bool(jnp.all((demo >= 0.0) & (demo <= 255.0)))

    # Same kind-signature with different magnitudes reuses the cached compiled kernel.
    n_cached = len(_COMPILED_CACHE)
    demo2_ops = [('Rotate', -12.0), ('ShearY', 0.1), ('TranslateX', -2.0), ('Zoom', 35.0),
                 ('Brightness', -0.2), ('Color', 0.1), ('Contrast', -0.3),
                 ('Sharpness', 0.2), ('Posterize', 6.0), ('Solarize', 64.0),
                 ('AutoContrast', 0.0)]
    demo2 = jax.block_until_ready(_apply_op_chain(imgs, demo2_ops, 0.0))
    assert demo2.shape == imgs.shape
    assert len(_COMPILED_CACHE) == n_cached

    print("KERNEL_OK")
</pallas_src>

<mosaic_0001>
module attributes {stable_mosaic.version = 11 : i64} {
  func.func @kernel(%arg0: i32, %arg1: memref<2xf32, #tpu.memory_space<smem>>, %arg2: memref<1x3x256xf32, #tpu.memory_space<vmem>>, %arg3: memref<1x3x256xf32, #tpu.memory_space<vmem>>) attributes {dimension_semantics = [#tpu.dimension_semantics<parallel>], iteration_bounds = array<i64: 2>, scalar_prefetch = 0 : i64, scratch_operands = 0 : i64, tpu.core_type = #tpu.core_type<tc>, window_params = [{transform_indices = @transform_0, window_bounds = array<i64: 2>}, {transform_indices = @transform_1, window_bounds = array<i64: 1, 3, 256>}, {transform_indices = @transform_2, window_bounds = array<i64: 1, 3, 256>}]} {
    %c0 = arith.constant 0 : index
    %c0_0 = arith.constant 0 : index
    %c0_1 = arith.constant 0 : index
    %0 = vector.load %arg2[%c0, %c0_0, %c0_1] : memref<1x3x256xf32, #tpu.memory_space<vmem>>, vector<1x3x256xf32>
    %1 = vector.shape_cast %0 : vector<1x3x256xf32> to vector<3x256xf32>
    %c0_2 = arith.constant 0 : index
    %2 = memref.load %arg1[%c0_2] : memref<2xf32, #tpu.memory_space<smem>>
    %3 = vector.broadcast %2 : f32 to vector<3x256xf32>
    %4 = arith.cmpf oge, %1, %3 : vector<3x256xf32>
    %cst = arith.constant 2.550000e+02 : f32
    %5 = vector.broadcast %cst : f32 to vector<3x256xf32>
    %6 = arith.subf %5, %1 : vector<3x256xf32>
    %7 = arith.select %4, %6, %1 : vector<3x256xi1>, vector<3x256xf32>
    %c0_3 = arith.constant 0 : index
    %c0_4 = arith.constant 0 : index
    %c0_5 = arith.constant 0 : index
    %8 = vector.load %arg3[%c0_3, %c0_4, %c0_5] : memref<1x3x256xf32, #tpu.memory_space<vmem>>, vector<1x3x256xf32>
    %9 = vector.shape_cast %8 : vector<1x3x256xf32> to vector<3x256xf32>
    %10 = vector.shape_cast %7 : vector<3x256xf32> to vector<1x3x256xf32>
    tpu.vector_store %arg3[%c0_3, %c0_4, %c0_5], %10 {strides = array<i32>} : memref<1x3x256xf32, #tpu.memory_space<vmem>>, vector<1x3x256xf32>,
    return
  }
  func.func @transform_0(%arg0: i32) -> i32 {
    %c0_i32 = arith.constant 0 : i32
    %c0_i32_0 = arith.constant 0 : i32
    return %c0_i32 : i32
  }
  func.func @transform_1(%arg0: i32) -> (i32, i32, i32) {
    %c0_i32 = arith.constant 0 : i32
    %c0_i32_0 = arith.constant 0 : i32
    %c0_i32_1 = arith.constant 0 : i32
    return %arg0, %c0_i32, %c0_i32_0 : i32, i32, i32
  }
  func.func @transform_2(%arg0: i32) -> (i32, i32, i32) {
    %c0_i32 = arith.constant 0 : i32
    %c0_i32_0 = arith.constant 0 : i32
    %c0_i32_1 = arith.constant 0 : i32
    return %arg0, %c0_i32, %c0_i32_0 : i32, i32, i32
  }
}

module attributes {stable_mosaic.version = 11 : i64} {
  func.func @kernel(%arg0: i32, %arg1: memref<2xf32, #tpu.memory_space<smem>>, %arg2: memref<1x3x256xf32, #tpu.memory_space<vmem>>, %arg3: memref<1x3x256xf32, #tpu.memory_space<vmem>>) attributes {dimension_semantics = [#tpu.dimension_semantics<parallel>], iteration_bounds = array<i64: 2>, scalar_prefetch = 0 : i64, scratch_operands = 0 : i64, tpu.core_type = #tpu.core_type<tc>, window_params = [{transform_indices = @transform_0, window_bounds = array<i64: 2>}, {transform_indices = @transform_1, window_bounds = array<i64: 1, 3, 256>}, {transform_indices = @transform_2, window_bounds = array<i64: 1, 3, 256>}]} {
    %c0 = arith.constant 0 : index
    %c0_0 = arith.constant 0 : index
    %c0_1 = arith.constant 0 : index
    %0 = vector.load %arg2[%c0, %c0_0, %c0_1] : memref<1x3x256xf32, #tpu.memory_space<vmem>>, vector<1x3x256xf32>
    %1 = vector.shape_cast %0 : vector<1x3x256xf32> to vector<3x256xf32>
    %c0_2 = arith.constant 0 : index
    %2 = memref.load %arg1[%c0_2] : memref<2xf32, #tpu.memory_space<smem>>
    %3 = vector.broadcast %2 : f32 to vector<3x256xf32>
    %4 = arith.cmpf oge, %1, %3 : vector<3x256xf32>
    %cst = arith.constant 2.550000e+02 : f32
    %5 = vector.broadcast %cst : f32 to vector<3x256xf32>
    %6 = arith.subf %5, %1 : vector<3x256xf32>
    %7 = arith.select %4, %6, %1 : vector<3x256xi1>, vector<3x256xf32>
    %c0_3 = arith.constant 0 : index
    %c0_4 = arith.constant 0 : index
    %c0_5 = arith.constant 0 : index
    %8 = vector.load %arg3[%c0_3, %c0_4, %c0_5] : memref<1x3x256xf32, #tpu.memory_space<vmem>>, vector<1x3x256xf32>
    %9 = vector.shape_cast %8 : vector<1x3x256xf32> to vector<3x256xf32>
    %10 = vector.shape_cast %7 : vector<3x256xf32> to vector<1x3x256xf32>
    tpu.vector_store %arg3[%c0_3, %c0_4, %c0_5], %10 {strides = array<i32>} : memref<1x3x256xf32, #tpu.memory_space<vmem>>, vector<1x3x256xf32>,
    return
  }
  func.func @transform_0(%arg0: i32) -> i32 {
    %c0_i32 = arith.constant 0 : i32
    %c0_i32_0 = arith.constant 0 : i32
    return %c0_i32 : i32
  }
  func.func @transform_1(%arg0: i32) -> (i32, i32, i32) {
    %c0_i32 = arith.constant 0 : i32
    %c0_i32_0 = arith.constant 0 : i32
    %c0_i32_1 = arith.constant 0 : i32
    return %arg0, %c0_i32, %c0_i32_0 : i32, i32, i32
  }
  func.func @transform_2(%arg0: i32) -> (i32, i32, i32) {
    %c0_i32 = arith.constant 0 : i32
    %c0_i32_0 = arith.constant 0 : i32
    %c0_i32_1 = arith.constant 0 : i32
    return %arg0, %c0_i32, %c0_i32_0 : i32, i32, i32
  }
}

</mosaic_0001>

<bundles_post_ra>
// kernel: tpu_custom_call.1
= control target key start
LH: loop header
LB: loop body
LE: loop exit
PB: predicated region body
PF: predicated region fallthrough
CT: control target
= control target key end

     0   :  { %7 = vsyncpa [#allocation3], 0  ;;  %s309_s9 = smov 0   ;;  %s329_s0 = inlined_call_operand.vmem [shape: f32[2], index: 0, kind: input, shape index: {}]   ;;  %s330_s1 = inlined_call_operand.vmem [shape: f32[2,3,256], index: 1, kind: input, shape index: {}]   ;;  %s331_s2 = inlined_call_operand.vmem [shape: f32[2,3,256], index: 2, kind: output, shape index: {}]  }
   0x1 LB: > { %s232_s10 = sadd.s32 4294967295, %s291_s9   ;;  %p234_p0 = scmp.ge.s32.totalorder %s291_s9, 1  ;;  %s291_s9 = sphi %s309_s9, %s13_s9  }
   0x2   : > { %p91_p1 = scmp.lt.s32.totalorder %s291_s9, 3  ;;  %s103_s13 = sshll.u32 %s329_s0, 4  ;;  %s104_s13 = int_to_ptr.vmem [resolvable:$true] %s103_s13 }
   0x3   : > { %p255_p3 = scmp.eq.s32.totalorder %s232_s10, 0  ;;  %s293_s14 = smov [#allocation2]  }
   0x4   : > { %p92_p2 = pnand %p234_p0, %p91_p1 }
   0x6   : > { %p251_p4 = pneg %p92_p2  ;;  %124 = sbr.rel (%p92_p2) target bundleno = 24 (0x18), region = 28 }
   0x8   : > { %p252_p5 = pnand %p255_p3, %p251_p4 }
   0xa   : > { %254 = dma.vmem_to_smem (!%p252_p5), %s104_s13, 16, %s293_s14, [#allocation3]  }
   0xb   : > { %286 = dma.done.wait (%p255_p3), [#allocation3], 16  }
   0xc   : > { %288 = vsyncadd (%p255_p3), [#allocation3], 4294967280 }
   0xd   : > { %131 = sfence }
   0xe   : > { %p148_p6 = scmp.lt.s32.totalorder %s232_s10, 1  ;;  %s159_s15 = sld [smem:[#allocation2]] }
  0x10   : > { %s333_s10 = smov (!%p148_p6, %s232_s10), 1 }
  0x11   : > { %s245_s16 = sshll.u32 %s333_s10, 3 }
  0x12   : > { %s152_s19 = scalar_lea.vmem %s330_s1, %s245_s16  ;;  %s157_s22 = scalar_lea.vmem %s331_s2, %s245_s16 }
  0x13   : > { %v158_v0 = vld [vmem:[%s152_s19] sm:$0x77] }
  0x14   : > { %v160_v1 = vstv %s159_s15  ;;  %v162_v2 = vsub.f32 255.0, %v158_v0 }
  0x15   : > { %vm161_vm0 = vcmp.ge.f32.partialorder %v158_v0, %v160_v1 }
  0x16   : > { %v163_v3 = vsel %vm161_vm0, %v162_v2, %v158_v0 }
  0x17   : > { %164 = vst [vmem:[%s157_s22] sm:$0x77] %v163_v3 }
  0x18 PF: > { %s13_s9 = sadd.s32 1, %s291_s9  }
  0x19   : > { %p10_p7 = scmp.ge.s32.totalorder %s13_s9, 4  }
  0x1b   :  { %12 = sbr.rel (!%p10_p7) target bundleno = 1 (0x1), region = 63 }
  0x20   :  { %186 = vsyncpa [#allocation3], 1 }
  0x21   :  { %188 = vsyncpa [#allocation3 + $0x1], 1 }

// kernel: tpu_custom_call.1
= control target key start
LH: loop header
LB: loop body
LE: loop exit
PB: predicated region body
PF: predicated region fallthrough
CT: control target
= control target key end

     0   :  { %7 = vsyncpa [#allocation3], 0  ;;  %s309_s9 = smov 0   ;;  %s329_s0 = inlined_call_operand.vmem [shape: f32[2], index: 0, kind: input, shape index: {}]   ;;  %s330_s1 = inlined_call_operand.vmem [shape: f32[2,3,256], index: 1, kind: input, shape index: {}]   ;;  %s331_s2 = inlined_call_operand.vmem [shape: f32[2,3,256], index: 2, kind: output, shape index: {}]  }
   0x1 LB: > { %s232_s10 = sadd.s32 4294967295, %s291_s9   ;;  %p234_p0 = scmp.ge.s32.totalorder %s291_s9, 1  ;;  %s291_s9 = sphi %s309_s9, %s13_s9  }
   0x2   : > { %p91_p1 = scmp.lt.s32.totalorder %s291_s9, 3  ;;  %s103_s13 = sshll.u32 %s329_s0, 4  ;;  %s104_s13 = int_to_ptr.vmem [resolvable:$true] %s103_s13 }
   0x3   : > { %p255_p3 = scmp.eq.s32.totalorder %s232_s10, 0  ;;  %s293_s14 = smov [#allocation2]  }
   0x4   : > { %p92_p2 = pnand %p234_p0, %p91_p1 }
   0x6   : > { %p251_p4 = pneg %p92_p2  ;;  %124 = sbr.rel (%p92_p2) target bundleno = 24 (0x18), region = 28 }
   0x8   : > { %p252_p5 = pnand %p255_p3, %p251_p4 }
   0xa   : > { %254 = dma.vmem_to_smem (!%p252_p5), %s104_s13, 16, %s293_s14, [#allocation3]  }
   0xb   : > { %286 = dma.done.wait (%p255_p3), [#allocation3], 16  }
   0xc   : > { %288 = vsyncadd (%p255_p3), [#allocation3], 4294967280 }
   0xd   : > { %131 = sfence }
   0xe   : > { %p148_p6 = scmp.lt.s32.totalorder %s232_s10, 1  ;;  %s159_s15 = sld [smem:[#allocation2]] }
  0x10   : > { %s333_s10 = smov (!%p148_p6, %s232_s10), 1 }
  0x11   : > { %s245_s16 = sshll.u32 %s333_s10, 3 }
  0x12   : > { %s152_s19 = scalar_lea.vmem %s330_s1, %s245_s16  ;;  %s157_s22 = scalar_lea.vmem %s331_s2, %s245_s16 }
  0x13   : > { %v158_v0 = vld [vmem:[%s152_s19] sm:$0x77] }
  0x14   : > { %v160_v1 = vstv %s159_s15  ;;  %v162_v2 = vsub.f32 255.0, %v158_v0 }
  0x15   : > { %vm161_vm0 = vcmp.ge.f32.partialorder %v158_v0, %v160_v1 }
  0x16   : > { %v163_v3 = vsel %vm161_vm0, %v162_v2, %v158_v0 }
  0x17   : > { %164 = vst [vmem:[%s157_s22] sm:$0x77] %v163_v3 }
  0x18 PF: > { %s13_s9 = sadd.s32 1, %s291_s9  }
  0x19   : > { %p10_p7 = scmp.ge.s32.totalorder %s13_s9, 4  }
  0x1b   :  { %12 = sbr.rel (!%p10_p7) target bundleno = 1 (0x1), region = 63 }
  0x20   :  { %186 = vsyncpa [#allocation3], 1 }
  0x21   :  { %188 = vsyncpa [#allocation3 + $0x1], 1 }

</bundles_post_ra>
